<compile_context>
chip_gen: v7x
topology: tpu7x:2x2x1
jax: 0.10.0
libtpu: 0.0.40
codegen_flags: <defaults>
</compile_context>

<pallas_src>
import functools

import jax
import jax.numpy as jnp
from jax.experimental import pallas as pl
from jax.experimental.pallas import tpu as pltpu

LOG_STD_MIN = -10.0
LOG_STD_MAX = 2.0
RESIDUAL = True


def _vmem_spec():
    return pl.BlockSpec(memory_space=pltpu.MemorySpace.VMEM)


def _round_up(x, m):
    return ((x + m - 1) // m) * m


# ----------------------------------------------------------------------------
# fused kernel: encoder + num_pred_steps of forward_step, single launch
# ----------------------------------------------------------------------------
def fused_inference_kernel(obs_ref, act_ref,
                           enc_w_ref, enc_b_ref,
                           w1_ref, b1_ref,
                           wh_ref, bh_ref,
                           out_ref,
                           *, t_obs, obs_dim, feat_dim, action_dim,
                           hidden_dim, num_pred_steps,
                           residual, log_std_min, log_std_max):
    bs = obs_ref.shape[0]

    # weights / biases loaded & broadcast ONCE (hoisted out of the unrolled loops)
    enc_w = enc_w_ref[...]                                         # (obs_dim, F)
    w1 = w1_ref[...]                                               # (T*F + A, H)
    wh = wh_ref[...]                                               # (H, 2F)
    enc_b = jnp.broadcast_to(enc_b_ref[...], (bs, feat_dim))
    b1 = jnp.broadcast_to(b1_ref[...], (bs, hidden_dim))
    bh = jnp.broadcast_to(bh_ref[...], (bs, 2 * feat_dim))

    # ---- get_feature: per-timestep linear encoder (history stays in vregs) ----
    feats = []
    for t in range(t_obs):
        obs_t = obs_ref[:, t * obs_dim:(t + 1) * obs_dim]          # (bs, obs_dim)
        feats.append(
            jnp.dot(obs_t, enc_w, preferred_element_type=jnp.float32) + enc_b)

    # ---- forward_with_feature: unrolled prediction loop ----
    outs = []
    for step in range(num_pred_steps):
        act = act_ref[:, step * action_dim:(step + 1) * action_dim]
        # one concatenated LHS -> one MXU push for the first layer
        x = jnp.concatenate(feats + [act], axis=-1)                # (bs, T*F + A)
        h = jnp.dot(x, w1, preferred_element_type=jnp.float32) + b1
        h = jnp.maximum(h, 0.0)                                    # ReLU
        # both heads in one matmul
        head = jnp.dot(h, wh, preferred_element_type=jnp.float32) + bh
        mu = head[:, :feat_dim]
        if residual:
            mu = mu + feats[-1]                                    # residual on last feature
        log_std = jnp.clip(head[:, feat_dim:], log_std_min, log_std_max)
        std = jnp.exp(log_std)

        outs.append(mu)
        outs.append(std)
        # cat_features: drop oldest step, append prediction
        # sample_from_distribution (eval mode): sample = dist.mean
        feats = feats[1:] + [mu]

    # single lane-dense store: (bs, num_pred_steps * 2 * feat_dim)
    out_ref[...] = jnp.concatenate(outs, axis=-1)


# ----------------------------------------------------------------------------
# Inference.forward wrapper (eval mode)
# ----------------------------------------------------------------------------
def inference_forward(obses, actions, params):
    """
    obses:   (bs, num_observation_steps, obs_dim)
    actions: (bs, num_pred_steps, action_dim)
    returns: (mu, std) of the stacked Normal, each (bs, num_pred_steps, feature_dim)
    """
    bs, t_obs, obs_dim = obses.shape
    num_pred_steps, action_dim = actions.shape[1], actions.shape[2]
    feat_dim = params["enc_w"].shape[1]
    hidden_dim = params["w1"].shape[1]

    # pad batch to a multiple of 8 sublanes
    bs_pad = max(8, _round_up(bs, 8))
    obs_flat = obses.reshape(bs, t_obs * obs_dim)
    act_flat = actions.reshape(bs, num_pred_steps * action_dim)
    if bs_pad != bs:
        pad = ((0, bs_pad - bs), (0, 0))
        obs_flat = jnp.pad(obs_flat, pad)
        act_flat = jnp.pad(act_flat, pad)

    kern = functools.partial(
        fused_inference_kernel,
        t_obs=t_obs, obs_dim=obs_dim, feat_dim=feat_dim,
        action_dim=action_dim, hidden_dim=hidden_dim,
        num_pred_steps=num_pred_steps,
        residual=RESIDUAL, log_std_min=LOG_STD_MIN, log_std_max=LOG_STD_MAX)

    slab = pl.pallas_call(
        kern,
        out_shape=jax.ShapeDtypeStruct(
            (bs_pad, num_pred_steps * 2 * feat_dim), jnp.float32),
        in_specs=[_vmem_spec()] * 8,
        out_specs=_vmem_spec(),
    )(obs_flat, act_flat,
      params["enc_w"], params["enc_b"],
      params["w1"], params["b1"],
      params["wh"], params["bh"])

    # stack_dist: split the lane-dense slab back into (bs, P, F) mu / std
    slab = slab[:bs].reshape(bs, num_pred_steps, 2 * feat_dim)
    mu = slab[..., :feat_dim]
    std = slab[..., feat_dim:]
    return mu, std


# ----------------------------------------------------------------------------
# parameters
# ----------------------------------------------------------------------------
def init_raw_params(key, obs_dim, feat_dim, t_obs, action_dim, hidden_dim):
    ks = jax.random.split(key, 6)
    s = 0.1
    return {
        "enc_w": s * jax.random.normal(ks[0], (obs_dim, feat_dim), jnp.float32),
        "enc_b": jnp.zeros((1, feat_dim), jnp.float32),
        "w1f": s * jax.random.normal(ks[1], (t_obs * feat_dim, hidden_dim), jnp.float32),
        "w1a": s * jax.random.normal(ks[2], (action_dim, hidden_dim), jnp.float32),
        "b1": jnp.zeros((1, hidden_dim), jnp.float32),
        "wmu": s * jax.random.normal(ks[3], (hidden_dim, feat_dim), jnp.float32),
        "bmu": jnp.zeros((1, feat_dim), jnp.float32),
        "wls": s * jax.random.normal(ks[4], (hidden_dim, feat_dim), jnp.float32),
        "bls": jnp.zeros((1, feat_dim), jnp.float32),
    }


def fuse_params(raw):
    """One-time (init-time) concatenation of paired weights -> single matmuls."""
    return {
        "enc_w": raw["enc_w"],
        "enc_b": raw["enc_b"],
        "w1": jnp.concatenate([raw["w1f"], raw["w1a"]], axis=0),   # (T*F+A, H)
        "b1": raw["b1"],
        "wh": jnp.concatenate([raw["wmu"], raw["wls"]], axis=1),   # (H, 2F)
        "bh": jnp.concatenate([raw["bmu"], raw["bls"]], axis=1),   # (1, 2F)
    }


# ----------------------------------------------------------------------------
# pure-JAX reference (mirrors the PyTorch module's math) for a correctness check
# ----------------------------------------------------------------------------
def reference_forward(obses, actions, raw):
    bs, t_obs, obs_dim = obses.shape
    num_pred_steps = actions.shape[1]
    features = jnp.matmul(obses, raw["enc_w"]) + raw["enc_b"]      # (bs, T, F)
    mus, stds = [], []
    for step in range(num_pred_steps):
        a = actions[:, step, :]
        flat = features.reshape(bs, -1)
        h = jnp.maximum(flat @ raw["w1f"] + a @ raw["w1a"] + raw["b1"], 0.0)
        mu = h @ raw["wmu"] + raw["bmu"]
        if RESIDUAL:
            mu = mu + features[:, -1, :]
        ls = jnp.clip(h @ raw["wls"] + raw["bls"], LOG_STD_MIN, LOG_STD_MAX)
        std = jnp.exp(ls)
        features = jnp.concatenate([features[:, 1:, :], mu[:, None, :]], axis=1)
        mus.append(mu)
        stds.append(std)
    return jnp.stack(mus, axis=-2), jnp.stack(stds, axis=-2)


if __name__ == "__main__":
    key = jax.random.PRNGKey(0)
    k_param, k_obs, k_act = jax.random.split(key, 3)

    bs = 2
    num_observation_steps = 3
    num_pred_steps = 2
    obs_dim = 16
    feature_dim = 32
    action_dim = 8
    hidden_dim = 64

    raw = init_raw_params(k_param, obs_dim, feature_dim,
                          num_observation_steps, action_dim, hidden_dim)
    params = fuse_params(raw)

    obses = jax.random.normal(k_obs, (bs, num_observation_steps, obs_dim), jnp.float32)
    actions = jax.random.normal(k_act, (bs, num_pred_steps, action_dim), jnp.float32)

    # TODO(synk): training-mode rsample / gumbel-softmax branch of
    # sample_from_distribution is stochastic; we implement the deterministic eval path.
    mu, std = jax.jit(lambda o, a: inference_forward(o, a, params))(obses, actions)
    jax.block_until_ready((mu, std))

    assert mu.shape == (bs, num_pred_steps, feature_dim)
    assert std.shape == (bs, num_pred_steps, feature_dim)
    assert bool(jnp.all(std > 0.0))
    assert bool(jnp.all(jnp.isfinite(mu))) and bool(jnp.all(jnp.isfinite(std)))

    # numerical check against the pure-JAX reference of the module's math
    mu_ref, std_ref = reference_forward(obses, actions, raw)
    assert bool(jnp.allclose(mu, mu_ref, rtol=1e-4, atol=1e-4))
    assert bool(jnp.allclose(std, std_ref, rtol=1e-4, atol=1e-4))

    print("KERNEL_OK")
</pallas_src>

<mosaic_0001>
module attributes {stable_mosaic.version = 11 : i64} {
  func.func @fused_inference_kernel(%arg0: memref<8x48xf32, #tpu.memory_space<vmem>>, %arg1: memref<8x16xf32, #tpu.memory_space<vmem>>, %arg2: memref<16x32xf32, #tpu.memory_space<vmem>>, %arg3: memref<1x32xf32, #tpu.memory_space<vmem>>, %arg4: memref<104x64xf32, #tpu.memory_space<vmem>>, %arg5: memref<1x64xf32, #tpu.memory_space<vmem>>, %arg6: memref<64x64xf32, #tpu.memory_space<vmem>>, %arg7: memref<1x64xf32, #tpu.memory_space<vmem>>, %arg8: memref<8x128xf32, #tpu.memory_space<vmem>>) attributes {dimension_semantics = [], scalar_prefetch = 0 : i64, scratch_operands = 0 : i64, tpu.core_type = #tpu.core_type<tc>} {
    %c0 = arith.constant 0 : index
    %c0_0 = arith.constant 0 : index
    %0 = vector.load %arg2[%c0, %c0_0] : memref<16x32xf32, #tpu.memory_space<vmem>>, vector<16x32xf32>
    %c0_1 = arith.constant 0 : index
    %c0_2 = arith.constant 0 : index
    %1 = vector.load %arg4[%c0_1, %c0_2] : memref<104x64xf32, #tpu.memory_space<vmem>>, vector<104x64xf32>
    %c0_3 = arith.constant 0 : index
    %c0_4 = arith.constant 0 : index
    %2 = vector.load %arg6[%c0_3, %c0_4] : memref<64x64xf32, #tpu.memory_space<vmem>>, vector<64x64xf32>
    %c0_5 = arith.constant 0 : index
    %c0_6 = arith.constant 0 : index
    %3 = vector.load %arg3[%c0_5, %c0_6] : memref<1x32xf32, #tpu.memory_space<vmem>>, vector<1x32xf32>
    %4 = vector.shape_cast %3 : vector<1x32xf32> to vector<1x32xf32>
    %5 = vector.broadcast %4 : vector<1x32xf32> to vector<8x32xf32>
    %c0_7 = arith.constant 0 : index
    %c0_8 = arith.constant 0 : index
    %6 = vector.load %arg5[%c0_7, %c0_8] : memref<1x64xf32, #tpu.memory_space<vmem>>, vector<1x64xf32>
    %7 = vector.shape_cast %6 : vector<1x64xf32> to vector<1x64xf32>
    %8 = vector.broadcast %7 : vector<1x64xf32> to vector<8x64xf32>
    %c0_9 = arith.constant 0 : index
    %c0_10 = arith.constant 0 : index
    %9 = vector.load %arg7[%c0_9, %c0_10] : memref<1x64xf32, #tpu.memory_space<vmem>>, vector<1x64xf32>
    %10 = vector.shape_cast %9 : vector<1x64xf32> to vector<1x64xf32>
    %11 = vector.broadcast %10 : vector<1x64xf32> to vector<8x64xf32>
    %c0_11 = arith.constant 0 : index
    %c0_12 = arith.constant 0 : index
    %12 = vector.load %arg0[%c0_11, %c0_12] : memref<8x48xf32, #tpu.memory_space<vmem>>, vector<8x16xf32>
    %cst = arith.constant dense<0.000000e+00> : vector<8x32xf32>
    %13 = tpu.matmul %12, %0, %cst {dimension_numbers = #tpu.dot_dimension_numbers<[1], [0], [0], [1], [0, 0, 1, 1], [], []>} : vector<8x16xf32>, vector<16x32xf32>, vector<8x32xf32> -> vector<8x32xf32>
    %14 = arith.addf %13, %5 : vector<8x32xf32>
    %c0_13 = arith.constant 0 : index
    %c16 = arith.constant 16 : index
    %15 = vector.load %arg0[%c0_13, %c16] : memref<8x48xf32, #tpu.memory_space<vmem>>, vector<8x16xf32>
    %cst_14 = arith.constant dense<0.000000e+00> : vector<8x32xf32>
    %16 = tpu.matmul %15, %0, %cst_14 {dimension_numbers = #tpu.dot_dimension_numbers<[1], [0], [0], [1], [0, 0, 1, 1], [], []>} : vector<8x16xf32>, vector<16x32xf32>, vector<8x32xf32> -> vector<8x32xf32>
    %17 = arith.addf %16, %5 : vector<8x32xf32>
    %c0_15 = arith.constant 0 : index
    %c32 = arith.constant 32 : index
    %18 = vector.load %arg0[%c0_15, %c32] : memref<8x48xf32, #tpu.memory_space<vmem>>, vector<8x16xf32>
    %cst_16 = arith.constant dense<0.000000e+00> : vector<8x32xf32>
    %19 = tpu.matmul %18, %0, %cst_16 {dimension_numbers = #tpu.dot_dimension_numbers<[1], [0], [0], [1], [0, 0, 1, 1], [], []>} : vector<8x16xf32>, vector<16x32xf32>, vector<8x32xf32> -> vector<8x32xf32>
    %20 = arith.addf %19, %5 : vector<8x32xf32>
    %c0_17 = arith.constant 0 : index
    %c0_18 = arith.constant 0 : index
    %21 = vector.load %arg1[%c0_17, %c0_18] : memref<8x16xf32, #tpu.memory_space<vmem>>, vector<8x8xf32>
    %22 = tpu.concatenate %14, %17, %20, %21 in 1 : vector<8x32xf32>, vector<8x32xf32>, vector<8x32xf32>, vector<8x8xf32> -> vector<8x104xf32>
    %cst_19 = arith.constant dense<0.000000e+00> : vector<8x64xf32>
    %23 = tpu.matmul %22, %1, %cst_19 {dimension_numbers = #tpu.dot_dimension_numbers<[1], [0], [0], [1], [0, 0, 1, 1], [], []>} : vector<8x104xf32>, vector<104x64xf32>, vector<8x64xf32> -> vector<8x64xf32>
    %24 = arith.addf %23, %8 : vector<8x64xf32>
    %cst_20 = arith.constant 0.000000e+00 : f32
    %25 = vector.broadcast %cst_20 : f32 to vector<8x64xf32>
    %26 = arith.maximumf %24, %25 : vector<8x64xf32>
    %cst_21 = arith.constant dense<0.000000e+00> : vector<8x64xf32>
    %27 = tpu.matmul %26, %2, %cst_21 {dimension_numbers = #tpu.dot_dimension_numbers<[1], [0], [0], [1], [0, 0, 1, 1], [], []>} : vector<8x64xf32>, vector<64x64xf32>, vector<8x64xf32> -> vector<8x64xf32>
    %28 = arith.addf %27, %11 : vector<8x64xf32>
    %29 = vector.extract_strided_slice %28 {offsets = [0, 0], sizes = [8, 32], strides = [1, 1]} : vector<8x64xf32> to vector<8x32xf32>
    %30 = arith.addf %29, %20 : vector<8x32xf32>
    %31 = vector.extract_strided_slice %28 {offsets = [0, 32], sizes = [8, 32], strides = [1, 1]} : vector<8x64xf32> to vector<8x32xf32>
    %cst_22 = arith.constant -1.000000e+01 : f32
    %cst_23 = arith.constant 2.000000e+00 : f32
    %32 = vector.broadcast %cst_22 : f32 to vector<8x32xf32>
    %33 = arith.maximumf %32, %31 : vector<8x32xf32>
    %34 = vector.broadcast %cst_23 : f32 to vector<8x32xf32>
    %35 = arith.minimumf %34, %33 : vector<8x32xf32>
    %36 = math.exp %35 : vector<8x32xf32>
    %c0_24 = arith.constant 0 : index
    %c8 = arith.constant 8 : index
    %37 = vector.load %arg1[%c0_24, %c8] : memref<8x16xf32, #tpu.memory_space<vmem>>, vector<8x8xf32>
    %38 = tpu.concatenate %17, %20, %30, %37 in 1 : vector<8x32xf32>, vector<8x32xf32>, vector<8x32xf32>, vector<8x8xf32> -> vector<8x104xf32>
    %cst_25 = arith.constant dense<0.000000e+00> : vector<8x64xf32>
    %39 = tpu.matmul %38, %1, %cst_25 {dimension_numbers = #tpu.dot_dimension_numbers<[1], [0], [0], [1], [0, 0, 1, 1], [], []>} : vector<8x104xf32>, vector<104x64xf32>, vector<8x64xf32> -> vector<8x64xf32>
    %40 = arith.addf %39, %8 : vector<8x64xf32>
    %cst_26 = arith.constant 0.000000e+00 : f32
    %41 = vector.broadcast %cst_26 : f32 to vector<8x64xf32>
    %42 = arith.maximumf %40, %41 : vector<8x64xf32>
    %cst_27 = arith.constant dense<0.000000e+00> : vector<8x64xf32>
    %43 = tpu.matmul %42, %2, %cst_27 {dimension_numbers = #tpu.dot_dimension_numbers<[1], [0], [0], [1], [0, 0, 1, 1], [], []>} : vector<8x64xf32>, vector<64x64xf32>, vector<8x64xf32> -> vector<8x64xf32>
    %44 = arith.addf %43, %11 : vector<8x64xf32>
    %45 = vector.extract_strided_slice %44 {offsets = [0, 0], sizes = [8, 32], strides = [1, 1]} : vector<8x64xf32> to vector<8x32xf32>
    %46 = arith.addf %45, %30 : vector<8x32xf32>
    %47 = vector.extract_strided_slice %44 {offsets = [0, 32], sizes = [8, 32], strides = [1, 1]} : vector<8x64xf32> to vector<8x32xf32>
    %cst_28 = arith.constant -1.000000e+01 : f32
    %cst_29 = arith.constant 2.000000e+00 : f32
    %48 = vector.broadcast %cst_28 : f32 to vector<8x32xf32>
    %49 = arith.maximumf %48, %47 : vector<8x32xf32>
    %50 = vector.broadcast %cst_29 : f32 to vector<8x32xf32>
    %51 = arith.minimumf %50, %49 : vector<8x32xf32>
    %52 = math.exp %51 : vector<8x32xf32>
    %53 = tpu.concatenate %30, %36, %46, %52 in 1 : vector<8x32xf32>, vector<8x32xf32>, vector<8x32xf32>, vector<8x32xf32> -> vector<8x128xf32>
    %c0_30 = arith.constant 0 : index
    %c0_31 = arith.constant 0 : index
    %54 = vector.load %arg8[%c0_30, %c0_31] : memref<8x128xf32, #tpu.memory_space<vmem>>, vector<8x128xf32>
    tpu.vector_store %arg8[%c0_30, %c0_31], %53 {strides = array<i32>} : memref<8x128xf32, #tpu.memory_space<vmem>>, vector<8x128xf32>,
    return
  }
}

</mosaic_0001>

<bundles_post_ra>
// kernel: _lambda_.1
= control target key start
LH: loop header
LB: loop body
LE: loop exit
PB: predicated region body
PF: predicated region fallthrough
CT: control target
= control target key end

     0   :  { %13 = vsyncpa [#allocation3], 0  ;;  %s1209_s0 = inlined_call_operand.vmem [shape: f32[8,48], index: 0, kind: input, shape index: {}]   ;;  %s1210_s1 = inlined_call_operand.vmem [shape: f32[8,16], index: 1, kind: input, shape index: {}]   ;;  %s1211_s2 = inlined_call_operand.hbm [shape: f32[16,32], index: 2, kind: input, shape index: {}]   ;;  %s1212_s3 = inlined_call_operand.vmem [shape: f32[1,32], index: 3, kind: input, shape index: {}]   ;;  %s1213_s4 = inlined_call_operand.hbm [shape: f32[104,64], index: 4, kind: input, shape index: {}]   ;;  %s1214_s5 = inlined_call_operand.vmem [shape: f32[1,64], index: 5, kind: input, shape index: {}, may-alias: {5,7}]   ;;  %s1215_s6 = inlined_call_operand.vmem [shape: f32[64,64], index: 6, kind: input, shape index: {}]   ;;  %s1216_s7 = inlined_call_operand.vmem [shape: f32[1,64], index: 7, kind: input, shape index: {}, may-alias: {5,7}]   ;;  %s1217_s8 = inlined_call_operand.vmem [shape: f32[8,128], index: 8, kind: output, shape index: {}]  }
   0x1   :  { %14 = vsyncpa [#allocation5], 0  ;;  %s994_s27 = smov [#allocation2]   ;;  %s946_s9 = scalar_lea.hbm %s1211_s2, 256 }
   0x2   :  { %s24_s28 = sshll.u32 %s994_s27, 4  ;;  %p947_p0 = scmp.ne.s32.totalorder %s1211_s2, %s946_s9  ;;  %s25_s28 = int_to_ptr.vmem [resolvable:$true] %s24_s28 }
   0x3   :  { %p950_p1 = scmp.lt.u32.totalorder %s946_s9, %s1211_s2 }
   0x5   :  { %p952_p2 = pnand %p950_p1, %p947_p0 }
   0x7   :  { %955 = shalt.err (!%p952_p2)
}
   0x8   :  { %s956_s14 = scalar_lea.vmem %s25_s28, 256  ;;  %p961_p4 = scmp.lt.s32.totalorder %s25_s28, %s25_s28 }
   0x9   :  { %p957_p3 = scmp.ne.s32.totalorder %s25_s28, %s956_s14  ;;  %p962_p5 = scmp.lt.s32.totalorder %s956_s14, %s956_s14 }
   0xb   :  { %p963_p6 = por %p962_p5, %p961_p4 }
   0xd   :  { %p964_p7 = pnand %p963_p6, %p957_p3 }
   0xf   :  { %967 = shalt.err (!%p964_p7)
}
  0x10   :  { %s995_s15 = smov 128   ;;  %s996_s16 = smov 8  }
  0x11   :  { %30 = dma.hbm_to_vmem [thread:$0]  %s1211_s2, 256, %s25_s28, [#allocation3], %s995_s15, %s995_s15, %s996_s16  }
  0x12   :  { %s997_s19 = smov [#allocation4]   ;;  %s968_s23 = scalar_lea.hbm %s1213_s4, 1664 }
  0x13   :  { %s38_s20 = sshll.u32 %s997_s19, 4  ;;  %p969_p8 = scmp.ne.s32.totalorder %s1213_s4, %s968_s23  ;;  %s39_s20 = int_to_ptr.vmem [resolvable:$true] %s38_s20 }
  0x14   :  { %p972_p9 = scmp.lt.u32.totalorder %s968_s23, %s1213_s4 }
  0x16   :  { %p974_p10 = pnand %p972_p9, %p969_p8 }
  0x18   :  { %977 = shalt.err (!%p974_p10)
}
  0x19   :  { %s978_s29 = scalar_lea.vmem %s39_s20, 1664  ;;  %p983_p12 = scmp.lt.s32.totalorder %s39_s20, %s39_s20 }
  0x1a   :  { %p979_p11 = scmp.ne.s32.totalorder %s39_s20, %s978_s29  ;;  %p984_p13 = scmp.lt.s32.totalorder %s978_s29, %s978_s29 }
  0x1c   :  { %p985_p0 = por %p984_p13, %p983_p12 }
  0x1e   :  { %p986_p1 = pnand %p985_p0, %p979_p11 }
  0x20   :  { %989 = shalt.err (!%p986_p1)
}
  0x21   :  { %44 = dma.hbm_to_vmem [thread:$0]  %s1213_s4, 1664, %s39_s20, [#allocation5], %s995_s15, %s995_s15, %s996_s16  }
  0x22   :  { %990 = dma.done.wait [#allocation3], 256  }
  0x23   :  { %991 = vsyncadd [#allocation3], 4294967040 }
  0x24   :  { %992 = dma.done.wait [#allocation5], 1664  }
  0x25   :  { %993 = vsyncadd [#allocation5], 4294965632  ;;  %v998_v0 = vmov 0.0|0.0   ;;  %vm999_vm0 = vmmov 0   ;;  %v1000_v1 = vmov 0.0   ;;  %v101_v2 = vld [vmem:[%s1209_s0] sm:$0xff] }
  0x26   :  { %861 = vmatprep.subr.bf16.mxu0 %v998_v0  ;;  %864 = vmatprep.subr.bf16.mxu1 %v998_v0  ;;  %v57_v3 = vld [vmem:[#allocation2] sm:$0xff]  ;;  %v58_v4 = vld [vmem:[#allocation2 + $0x8] sm:$0xff]  ;;  %s1001_s4 = smov 112   ;;  %vm102_vm1 = vcmask 130048   ;;  %s1002_s10 = smov 96   ;;  %v59_v9 = vld [vmem:[#allocation4] sm:$0xff] }
  0x27   :  { %748 = vmatprep.mubr.msk.f32.mxu0 %vm999_vm0, %v1000_v1  ;;  %755 = vmatprep.mubr.msk.f32.mxu1 %vm999_vm0, %v1000_v1  ;;  %v862_v5 = vpack.c.bf16 %v58_v4, %v57_v3  ;;  %v1096_v8 = vld [vmem:[%s1210_s1] sm:$0xff]  ;;  %v60_v10 = vld [vmem:[#allocation4 + $0x8] sm:$0xff]  ;;  %v62_v13 = vld [vmem:[#allocation4 + $0x18] sm:$0xff]  ;;  %s1003_s24 = smov 32   ;;  %s1004_s25 = smov 64   ;;  %vm337_vm2 = vcmask 261120  }
  0x28   :  { %176 = vrot.lane.b32.xlu0 %v101_v2, %s1001_s4  ;;  %v61_v11 = vld [vmem:[#allocation4 + $0x10] sm:$0xff]  ;;  %v1099_v12 = vpack.c.bf16 %v60_v10, %v59_v9  ;;  %v63_v15 = vld [vmem:[#allocation4 + $0x20] sm:$0xff]  ;;  %v64_v16 = vld [vmem:[#allocation4 + $0x28] sm:$0xff]  ;;  %vm339_vm3 = vcmask 523264   ;;  %vm341_vm4 = vcmask 785408   ;;  %vm343_vm5 = vcmask 850944  }
  0x29   :  { %863 = vmatpush3.bf16.msra.mxu0 %v862_v5  ;;  %866 = vmatpush3.bf16.msra.mxu1 %v862_v5  ;;  %v1102_v14 = vpack.c.bf16 %v62_v13, %v61_v11  ;;  %v1106_v18 = vpack.c.bf16 %v64_v16, %v63_v15  ;;  %v65_v20 = vld [vmem:[#allocation4 + $0x30] sm:$0xff]  ;;  %v66_v21 = vld [vmem:[#allocation4 + $0x38] sm:$0xff]  ;;  %v67_v23 = vld [vmem:[#allocation4 + $0x40] sm:$0xff] }
  0x2a   :  { %867 = vmatprep.subr.bf16.mxu0 %v998_v0  ;;  %870 = vmatprep.subr.bf16.mxu1 %v998_v0  ;;  %v1110_v22 = vpack.c.bf16 %v66_v21, %v65_v20  ;;  %v68_v24 = vld [vmem:[#allocation4 + $0x48] sm:$0xff]  ;;  %v69_v26 = vld [vmem:[#allocation4 + $0x50] sm:$0xff]  ;;  %v70_v27 = vld [vmem:[#allocation4 + $0x58] sm:$0xff] }
  0x2b   :  { %v1114_v25 = vpack.c.bf16 %v68_v24, %v67_v23  ;;  %v1119_v28 = vpack.c.bf16 %v70_v27, %v69_v26  ;;  %v1123_v29 = vld [vmem:[#allocation4 + $0x60] sm:$0xff]  ;;  %v679_v30 = vld [vmem:[%s1212_s3] ss:$0 sm:$0xff]  ;;  %v73_v32 = vld [vmem:[%s1215_s6 + $0x8] sm:$0xff] }
  0x2c   :  { %250 = vrot.lane.b32.xlu0 %v101_v2, %s1002_s10  ;;  %749 = vmatmul.mubr.msk.f32.vlgmr.msra.gmra.mrb[0].mxu0 %vm102_vm1, %v101_v2  ;;  %v72_v31 = vld [vmem:[%s1215_s6] sm:$0xff]  ;;  %v74_v33 = vld [vmem:[%s1215_s6 + $0x10] sm:$0xff]  ;;  %v75_v35 = vld [vmem:[%s1215_s6 + $0x18] sm:$0xff] }
  0x2d   :  { %869 = vmatpush3.bf16.msra.mxu0 %v862_v5  ;;  %762 = vmatprep.mubr.msk.f32.mxu0 %vm999_vm0, %v1000_v1  ;;  %v889_v34 = vpack.c.bf16 %v73_v32, %v72_v31  ;;  %v892_v39 = vpack.c.bf16 %v75_v35, %v74_v33  ;;  %v76_v40 = vld [vmem:[%s1215_s6 + $0x20] sm:$0xff]  ;;  %v77_v41 = vld [vmem:[%s1215_s6 + $0x28] sm:$0xff]  ;;  %v78_v53 = vld [vmem:[%s1215_s6 + $0x30] sm:$0xff] }
  0x2e   :  { %888 = vmatprep.subr.bf16.mxu0 %v998_v0  ;;  %v895_v45 = vpack.c.bf16 %v77_v41, %v76_v40  ;;  %v79_v54 = vld [vmem:[%s1215_s6 + $0x38] sm:$0xff]  ;;  %v680_v56 = vld [vmem:[%s1214_s5] ss:$0 sm:$0xff]  ;;  %s1005_s5 = smov 88  }
  0x2f   :  { %v898_v55 = vpack.c.bf16 %v79_v54, %v78_v53  ;;  %v681_v61 = vld [vmem:[%s1216_s7] ss:$0 sm:$0xff] }
  0x30   :  { %334 = vrot.lane.b32.xlu0 %v1096_v8, %s1002_s10 }
  0x9a   :  { %v177_v6 = vpop.permute.xlu0 %176 }
  0x9b   :  { %756 = vmatmul.mubr.msk.f32.vlgmr.msra.gmra.mrb[0].mxu1 %vm102_vm1, %v177_v6 }
  0x9c   :  { %791 = vmatprep.mubr.msk.f32.mxu1 %vm999_vm0, %v1000_v1  ;;  %872 = vmatpush3.bf16.msra.mxu1 %v1099_v12 }
  0x9d   :  { %873 = vmatprep.subr.bf16.mxu1 %v998_v0 }
  0x9e   :  { %v251_v7 = vpop.permute.xlu0 %250 }
  0x9f   :  { %763 = vmatmul.mubr.msk.f32.vlgmr.msra.gmra.mrb[2].mxu0 %vm102_vm1, %v251_v7 }
  0xa0   :  { %810 = vmatprep.mubr.msk.f32.mxu0 %vm999_vm0, %v1000_v1  ;;  %875 = vmatpush3.bf16.msra.mxu1 %v1102_v14 }
  0xa1   :  { %876 = vmatprep.subr.bf16.mxu1 %v998_v0  ;;  %890 = vmatpush3.bf16.msra.mxu0 %v889_v34 }
  0xa2   :  { %891 = vmatprep.subr.bf16.mxu0 %v998_v0  ;;  %v335_v48 = vpop.permute.xlu0 %334 }
  0xa4   :  { %878 = vmatpush3.bf16.msra.mxu1 %v1106_v18 }
  0xa5   :  { %879 = vmatprep.subr.bf16.mxu1 %v998_v0  ;;  %893 = vmatpush3.bf16.msra.mxu0 %v892_v39 }
  0xa6   :  { %894 = vmatprep.subr.bf16.mxu0 %v998_v0 }
  0xa8   :  { %881 = vmatpush3.bf16.msra.mxu1 %v1110_v22 }
  0xa9   :  { %882 = vmatprep.subr.bf16.mxu1 %v998_v0  ;;  %896 = vmatpush3.bf16.msra.mxu0 %v895_v45 }
  0xaa   :  { %897 = vmatprep.subr.bf16.mxu0 %v998_v0 }
  0xac   :  { %884 = vmatpush3.bf16.msra.mxu1 %v1114_v25 }
  0xad   :  { %885 = vmatprep.subr.bf16.mxu1 %v998_v0  ;;  %899 = vmatpush3.bf16.msra.mxu0 %v898_v55 }
  0xae   :  { %900 = vmatprep.subr.bf16.mxu0 %v998_v0 }
  0xb0   :  { %887 = vmatpush3.bf16.msra.mxu1 %v1119_v28 }
  0xb1   :  { %789 = vmatprep.subr.mxu1 %v1000_v1 }
  0xb4   :  { %790 = vmatpush3.msra.mxu1 %v1123_v29 }
  0xb5   :  { %918 = vmatprep.subr.bf16.mxu1 %v998_v0 }
  0xff   :  { %v172_v17 = vpop.f32.mrb[0].mxu0 }
 0x100   :  { %v750_v19 = vpop.f32.mrb[1].mxu0  ;;  %v173_v47 = vadd.f32 %v679_v30, %v172_v17 }
 0x16e   :  { %v246_v36 = vpop.f32.mrb[0].mxu1 }
 0x16f   :  { %v1142_v37 = vadd.f32 %v679_v30, %v246_v36  ;;  %v757_v38 = vpop.f32.mrb[1].mxu1 }
 0x171   :  { %326 = vrot.lane.b32.xlu1 %v1142_v37, %s1003_s24 }
 0x172   :  { %v320_v42 = vpop.f32.mrb[2].mxu0 }
 0x173   :  { %v321_v43 = vadd.f32 %v679_v30, %v320_v42  ;;  %v764_v44 = vpop.f32.mrb[3].mxu0 }
 0x175   :  { %330 = vrot.lane.b32.xlu1 %v321_v43, %s1004_s25 }
 0x179   :  { %496 = vrot.lane.b32.xlu1 %v321_v43, %s1003_s24 }
 0x17d   :  { %503 = vrot.lane.b32.xlu1 %v1096_v8, %s1005_s5 }
 0x1e3   :  { %v327_v46 = vpop.permute.xlu1 %326 }
 0x1e4   :  { %v338_v49 = vsel %vm337_vm2, %v173_v47, %v327_v46 }
 0x1e7   :  { %v331_v50 = vpop.permute.xlu1 %330 }
 0x1e8   :  { %v340_v51 = vsel %vm339_vm3, %v338_v49, %v331_v50 }
 0x1e9   :  { %v342_v52 = vsel %vm341_vm4, %v340_v51, %v335_v48 }
 0x1ea   :  { %792 = vmatmul.mubr.msk.f32.vlgmr.msra.gmra.mrb[2].mxu1 %vm343_vm5, %v342_v52 }
 0x1eb   :  { %920 = vmatpush3.bf16.msra.mxu1 %v889_v34  ;;  %858 = vmatprep.mubr.msk.f32.mxu1 %vm999_vm0, %v1000_v1 }
 0x1ec   :  { %921 = vmatprep.subr.bf16.mxu1 %v998_v0 }
 0x1ef   :  { %923 = vmatpush3.bf16.msra.mxu1 %v892_v39 }
 0x1f0   :  { %924 = vmatprep.subr.bf16.mxu1 %v998_v0 }
 0x1f3   :  { %926 = vmatpush3.bf16.msra.mxu1 %v895_v45 }
 0x1f4   :  { %927 = vmatprep.subr.bf16.mxu1 %v998_v0 }
 0x1f7   :  { %929 = vmatpush3.bf16.msra.mxu1 %v898_v55 }
 0x2bd   :  { %v413_v57 = vpop.f32.mrb[2].mxu1 }
 0x2be   :  { %v414_v58 = vadd.f32 %v680_v56, %v413_v57  ;;  %v793_v59 = vpop.f32.mrb[3].mxu1 }
 0x2c0   :  { %v417_v60 = vmax.f32 %v414_v58, 0.0 }
 0x2c2   :  { %811 = vmatmul.mubr.msk.f32.vlgmr.msra.gmra.mrb[4].mxu0 %vm339_vm3, %v417_v60 }
 0x2c3   :  { %902 = vmatpush3.bf16.msra.mxu0 %v1099_v12  ;;  %839 = vmatprep.mubr.msk.f32.mxu0 %vm999_vm0, %v1000_v1 }
 0x2c4   :  { %903 = vmatprep.subr.bf16.mxu0 %v998_v0 }
 0x2c7   :  { %905 = vmatpush3.bf16.msra.mxu0 %v1102_v14 }
 0x2c8   :  { %906 = vmatprep.subr.bf16.mxu0 %v998_v0 }
 0x2cb   :  { %908 = vmatpush3.bf16.msra.mxu0 %v1106_v18 }
 0x2cc   :  { %909 = vmatprep.subr.bf16.mxu0 %v998_v0 }
 0x2cf   :  { %911 = vmatpush3.bf16.msra.mxu0 %v1110_v22 }
 0x2d0   :  { %912 = vmatprep.subr.bf16.mxu0 %v998_v0 }
 0x2d3   :  { %914 = vmatpush3.bf16.msra.mxu0 %v1114_v25 }
 0x2d4   :  { %915 = vmatprep.subr.bf16.mxu0 %v998_v0  ;;  %v497_v0 = vpop.permute.xlu1 %496 }
 0x2d7   :  { %917 = vmatpush3.bf16.msra.mxu0 %v1119_v28 }
 0x2d8   :  { %837 = vmatprep.subr.mxu0 %v1000_v1  ;;  %v504_v4 = vpop.permute.xlu1 %503  ;;  %v506_v1 = vsel %vm337_vm2, %v1142_v37, %v497_v0 }
 0x2db   :  { %838 = vmatpush3.msra.mxu0 %v1123_v29 }
 0x395   :  { %v487_v62 = vpop.f32.mrb[4].mxu0 }
 0x396   :  { %v488_v63 = vadd.f32 %v681_v61, %v487_v62  ;;  %v812_v2 = vpop.f32.mrb[5].mxu0 }
 0x398   :  { %v491_v3 = vadd.f32 %v488_v63, %v321_v43  ;;  %v492_v20 = vmax.f32 %v488_v63, -10.0 }
 0x39a   :  { %500 = vrot.lane.b32.xlu0 %v491_v3, %s1004_s25  ;;  %v493_v21 = vmin.f32 %v492_v20, 2.0 }
 0x39c   :  { %v494_v22 = vmul.f32 1.442695, %v493_v21 }
 0x40c   :  { %v501_v5 = vpop.permute.xlu0 %500 }
 0x40d   :  { %v507_v6 = vsel %vm339_vm3, %v506_v1, %v501_v5 }
 0x40e   :  { %v508_v7 = vsel %vm341_vm4, %v507_v6, %v504_v4 }
 0x40f   :  { %840 = vmatmul.mubr.msk.f32.vlgmr.msra.gmra.mrb[6].mxu0 %vm343_vm5, %v508_v7 }
 0x4e2   :  { %v578_v8 = vpop.f32.mrb[6].mxu0 }
 0x4e3   :  { %v579_v9 = vadd.f32 %v680_v56, %v578_v8  ;;  %v841_v10 = vpop.f32.mrb[7].mxu0 }
 0x4e5   :  { %v582_v11 = vmax.f32 %v579_v9, 0.0 }
 0x4e7   :  { %859 = vmatmul.mubr.msk.f32.vlgmr.msra.gmra.mrb[4].mxu1 %vm339_vm3, %v582_v11 }
 0x5ba   :  { %v652_v12 = vpop.f32.mrb[4].mxu1 }
 0x5bb   :  { %v653_v13 = vadd.f32 %v681_v61, %v652_v12  ;;  %v860_v14 = vpop.f32.mrb[5].mxu1 }
 0x5bd   :  { %v656_v15 = vadd.f32 %v653_v13, %v491_v3  ;;  %v657_v16 = vmax.f32 %v653_v13, -10.0 }
 0x5bf   :  { %v658_v17 = vmin.f32 %v657_v16, 2.0  ;;  %662 = vrot.lane.b32.xlu0 %v656_v15, %s1004_s25 }
 0x5c1   :  { %v659_v18 = vmul.f32 1.442695, %v658_v17 }
 0x5c3   :  { %942 = vpow2.f32 %v659_v18 }
 0x5c4   :  { %944 = vpow2.f32 %v494_v22 }
 0x5cd   :  { %v943_v19 = vpop.eup %942 }
 0x5ce   :  { %666 = vrot.lane.b32.xlu1 %v943_v19, %s1004_s25  ;;  %v945_v23 = vpop.eup %944 }
 0x5cf   :  { %v669_v25 = vsel %vm337_vm2, %v491_v3, %v945_v23 }
 0x631   :  { %v663_v24 = vpop.permute.xlu0 %662 }
 0x632   :  { %v670_v26 = vsel %vm339_vm3, %v669_v25, %v663_v24 }
 0x640   :  { %v667_v27 = vpop.permute.xlu1 %666 }
 0x641   :  { %v671_v28 = vsel %vm341_vm4, %v670_v26, %v667_v27 }
 0x642   :  { %672 = vst [vmem:[%s1217_s8] sm:$0xff] %v671_v28 }
 0x643   :  { %677 = vsyncpa [#allocation3], 1 }
 0x644   :  { %678 = vsyncpa [#allocation5], 1 }

</bundles_post_ra>
